<compile_context>
chip_gen: v6e
topology: v6e:2x2x1
jax: 0.10.0
libtpu: 0.0.40
codegen_flags: <defaults>
</compile_context>

<pallas_src>
import jax
import jax.numpy as jnp
from jax.experimental import pallas as pl
from jax.experimental.pallas import tpu as pltpu

# ---- model dimensions (small, consistent with Graph_Module) ----
B = 2            # batch
K = 8            # graph nodes
IND = 32         # indim
HID = 32         # hiddim
OUTD = 32        # outdim (must equal indim: module adds graph_nodes residual)
NH = 4           # number of GCN heads (self.h)
DK = OUTD // NH  # per-head output dim
N = B * K        # flattened rows
EPS = 1e-6


def graph_module_kernel(x_ref, adj_ref, w1_ref, w2_ref, wff_ref, vec_ref, out_ref):
    x = x_ref[...]                                   # (N, IND)
    a1 = adj_ref[0]                                  # (N, N) block-diag adj (graph[:,1])
    a4 = adj_ref[1]                                  # (N, N) block-diag adj (graph[:,4])
    vecs = vec_ref[...]                              # (8, NH*HID) packed vectors

    b1 = vecs[0:1, :]                                # (1, NH*HID) gc1 biases (4 heads)
    b2 = vecs[1:2, :OUTD]                            # (1, OUTD)   gc2 biases (4 heads)
    ln_a = vecs[2:3, :OUTD]                          # LayerNorm a_2
    ln_b = vecs[3:4, :OUTD]                          # LayerNorm b_2
    bf1 = vecs[4:5, :HID]                            # FFN w_1 bias
    bf2 = vecs[5:6, :OUTD]                           # FFN w_2 bias

    # --- GCN layer 1, all 4 heads fused lane-wise ---
    # heads 0,1 use adjacency #1; heads 2,3 use adjacency #4 (lane select, no concat)
    s = jnp.dot(x, w1_ref[...], preferred_element_type=jnp.float32)      # (N, 4*HID)
    lane_h = jax.lax.broadcasted_iota(jnp.int32, (1, NH * HID), 1)
    ah = jnp.where(lane_h < 2 * HID,
                   jnp.dot(a1, s, preferred_element_type=jnp.float32),
                   jnp.dot(a4, s, preferred_element_type=jnp.float32))
    h = jnp.maximum(ah + b1, 0.0)                    # relu; dropout = identity (eval)

    # --- GCN layer 2: block-diagonal weight keeps the 4 heads lane-separated ---
    z = jnp.dot(h, w2_ref[...], preferred_element_type=jnp.float32)      # (N, OUTD)
    lane_o = jax.lax.broadcasted_iota(jnp.int32, (1, OUTD), 1)
    g_cat = jnp.where(lane_o < 2 * DK,
                      jnp.dot(a1, z, preferred_element_type=jnp.float32),
                      jnp.dot(a4, z, preferred_element_type=jnp.float32)) + b2

    # --- LayerNorm (torch-style unbiased std) + residual with input features ---
    mean = jnp.mean(g_cat, axis=-1, keepdims=True)
    c = g_cat - mean
    std = jnp.sqrt(jnp.sum(c * c, axis=-1, keepdims=True) / (OUTD - 1))
    g = ln_a * c / (std + EPS) + ln_b + x                                # (N, OUTD)

    # --- PositionwiseFeedForward (dropout = identity) + residual ---
    f = jnp.maximum(jnp.dot(g, wff_ref[0], preferred_element_type=jnp.float32) + bf1, 0.0)
    out_ref[...] = jnp.dot(f, wff_ref[1], preferred_element_type=jnp.float32) + bf2 + g


def _full_spec(shape):
    nd = len(shape)
    return pl.BlockSpec(shape, lambda i, _nd=nd: (0,) * _nd)


def graph_module_forward(params, graph_nodes, graph):
    """Returns (adj, graph_encode_features) like Graph_Module.forward (eval mode)."""
    if graph.size == 0:
        # TODO(synk): get_adj() path uses edge_layer_1/edge_layer_2/combined_dim
        # which the original module never defines; not implementable faithfully.
        raise NotImplementedError("empty-graph branch (get_adj) is undefined in the module")
    if graph_nodes.shape[0] != graph.shape[0]:
        graph_nodes = jnp.swapaxes(graph_nodes, 0, 1)

    adj = graph.astype(jnp.float32)                  # (B, 5, K, K) - returned as-is
    a1 = adj[:, 1]                                   # (B, K, K)
    a4 = adj[:, 4]

    # Fold the batch into the row axis with block-diagonal adjacencies (built once
    # on the host) so the kernel does plain 2-D matmuls, no batched dot_general.
    eye = jnp.eye(B, dtype=jnp.float32)
    a1_bd = jnp.einsum('bc,bij->bicj', eye, a1).reshape(N, N)
    a4_bd = jnp.einsum('bc,bij->bicj', eye, a4).reshape(N, N)
    adj_bd = jnp.stack([a1_bd, a4_bd], axis=0)       # (2, N, N)

    x = graph_nodes.reshape(N, IND).astype(jnp.float32)

    inputs = (x, adj_bd, params['w1_all'], params['w2_bd'], params['wff'], params['vecs'])
    out = pl.pallas_call(
        graph_module_kernel,
        out_shape=jax.ShapeDtypeStruct((N, OUTD), jnp.float32),
        grid=(1,),
        in_specs=[_full_spec(a.shape) for a in inputs],
        out_specs=_full_spec((N, OUTD)),
        compiler_params=pltpu.CompilerParams(dimension_semantics=("arbitrary",)),
    )(*inputs)
    return adj, out.reshape(B, K, OUTD)


def init_params(key):
    assert IND == HID == OUTD, "packing assumes indim == hiddim == outdim"
    ks = jax.random.split(key, 22)

    def w(k, din, dout):
        return jax.random.normal(k, (din, dout), jnp.float32) * 0.1

    gcn = []
    idx = 0
    for _ in range(NH):
        w1 = w(ks[idx], IND, HID); idx += 1
        b1 = jax.random.normal(ks[idx], (HID,), jnp.float32) * 0.1; idx += 1
        w2 = w(ks[idx], HID, DK); idx += 1
        b2 = jax.random.normal(ks[idx], (DK,), jnp.float32) * 0.1; idx += 1
        gcn.append((w1, b1, w2, b2))

    ln_a = 1.0 + 0.1 * jax.random.normal(ks[idx], (OUTD,), jnp.float32); idx += 1
    ln_b = 0.1 * jax.random.normal(ks[idx], (OUTD,), jnp.float32); idx += 1
    ff_w1 = w(ks[idx], IND, HID); idx += 1
    ff_b1 = 0.1 * jax.random.normal(ks[idx], (HID,), jnp.float32); idx += 1
    ff_w2 = w(ks[idx], HID, OUTD); idx += 1
    ff_b2 = 0.1 * jax.random.normal(ks[idx], (OUTD,), jnp.float32); idx += 1

    # ---- packed slabs for the kernel ----
    w1_all = jnp.concatenate([g[0] for g in gcn], axis=1)        # (IND, NH*HID) = (32,128)
    b1_all = jnp.concatenate([g[1] for g in gcn], axis=0)        # (NH*HID,)
    w2_bd = jnp.zeros((NH * HID, NH * DK), jnp.float32)          # (128, 32) block-diag
    for h in range(NH):
        w2_bd = w2_bd.at[h * HID:(h + 1) * HID, h * DK:(h + 1) * DK].set(gcn[h][2])
    b2_all = jnp.concatenate([g[3] for g in gcn], axis=0)        # (OUTD,)
    wff = jnp.stack([ff_w1, ff_w2], axis=0)                      # (2, 32, 32)

    vecs = jnp.zeros((8, NH * HID), jnp.float32)                 # (8, 128) bias/vector slab
    vecs = vecs.at[0, :].set(b1_all)
    vecs = vecs.at[1, :OUTD].set(b2_all)
    vecs = vecs.at[2, :OUTD].set(ln_a)
    vecs = vecs.at[3, :OUTD].set(ln_b)
    vecs = vecs.at[4, :HID].set(ff_b1)
    vecs = vecs.at[5, :OUTD].set(ff_b2)

    return dict(gcn=gcn, ln_a=ln_a, ln_b=ln_b,
                ff_w1=ff_w1, ff_b1=ff_b1, ff_w2=ff_w2, ff_b2=ff_b2,
                w1_all=w1_all, w2_bd=w2_bd, wff=wff, vecs=vecs)


def reference_forward(params, graph_nodes, graph):
    """Pure-JAX reference mirroring the PyTorch Graph_Module forward (eval mode)."""
    adj = graph.astype(jnp.float32)
    adj_list = [adj[:, 1], adj[:, 1], adj[:, 4], adj[:, 4]]
    feats = []
    for (w1, b1, w2, b2), a in zip(params['gcn'], adj_list):
        h = jax.nn.relu(jnp.einsum('bij,bjh->bih', a, graph_nodes @ w1) + b1)
        o = jnp.einsum('bij,bjh->bih', a, h @ w2) + b2    # no relu after gc2
        feats.append(o)
    gcat = jnp.concatenate(feats, axis=2)                 # (B, K, OUTD)
    mean = gcat.mean(-1, keepdims=True)
    std = jnp.sqrt(((gcat - mean) ** 2).sum(-1, keepdims=True) / (OUTD - 1))  # torch unbiased std
    g = params['ln_a'] * (gcat - mean) / (std + EPS) + params['ln_b'] + graph_nodes
    f = jax.nn.relu(g @ params['ff_w1'] + params['ff_b1']) @ params['ff_w2'] + params['ff_b2']
    return adj, f + g


if __name__ == "__main__":
    key = jax.random.PRNGKey(0)
    kp, k1, k2 = jax.random.split(key, 3)
    params = init_params(kp)

    graph_nodes = jax.random.normal(k1, (B, K, IND), jnp.float32) * 0.5   # (B, K, indim)
    graph = jax.random.normal(k2, (B, 5, K, K), jnp.float32) * 0.3        # (B, 5, K, K)

    adj, feats = graph_module_forward(params, graph_nodes, graph)
    adj = jax.block_until_ready(adj)
    feats = jax.block_until_ready(feats)

    ref_adj, ref_feats = reference_forward(params, graph_nodes, graph)
    assert adj.shape == (B, 5, K, K)
    assert feats.shape == (B, K, OUTD)
    assert jnp.allclose(adj, ref_adj)
    assert jnp.allclose(feats, ref_feats, atol=2e-3, rtol=2e-3)
    print("KERNEL_OK")
</pallas_src>

<mosaic_0001>
module attributes {stable_mosaic.version = 11 : i64} {
  func.func @graph_module_kernel(%arg0: i32, %arg1: memref<16x32xf32, #tpu.memory_space<vmem>>, %arg2: memref<2x16x16xf32, #tpu.memory_space<vmem>>, %arg3: memref<32x128xf32, #tpu.memory_space<vmem>>, %arg4: memref<128x32xf32, #tpu.memory_space<vmem>>, %arg5: memref<2x32x32xf32, #tpu.memory_space<vmem>>, %arg6: memref<8x128xf32, #tpu.memory_space<vmem>>, %arg7: memref<16x32xf32, #tpu.memory_space<vmem>>) attributes {dimension_semantics = [#tpu.dimension_semantics<arbitrary>], iteration_bounds = array<i64: 1>, scalar_prefetch = 0 : i64, scratch_operands = 0 : i64, tpu.core_type = #tpu.core_type<tc>, window_params = [{pipeline_mode = #tpu.pipeline_mode<synchronous>, transform_indices = @transform_0, window_bounds = array<i64: 16, 32>}, {pipeline_mode = #tpu.pipeline_mode<synchronous>, transform_indices = @transform_1, window_bounds = array<i64: 2, 16, 16>}, {pipeline_mode = #tpu.pipeline_mode<synchronous>, transform_indices = @transform_2, window_bounds = array<i64: 32, 128>}, {pipeline_mode = #tpu.pipeline_mode<synchronous>, transform_indices = @transform_3, window_bounds = array<i64: 128, 32>}, {pipeline_mode = #tpu.pipeline_mode<synchronous>, transform_indices = @transform_4, window_bounds = array<i64: 2, 32, 32>}, {pipeline_mode = #tpu.pipeline_mode<synchronous>, transform_indices = @transform_5, window_bounds = array<i64: 8, 128>}, {pipeline_mode = #tpu.pipeline_mode<synchronous>, transform_indices = @transform_6, window_bounds = array<i64: 16, 32>}]} {
    %c0 = arith.constant 0 : index
    %c0_0 = arith.constant 0 : index
    %0 = vector.load %arg1[%c0, %c0_0] : memref<16x32xf32, #tpu.memory_space<vmem>>, vector<16x32xf32>
    %c0_1 = arith.constant 0 : index
    %c0_2 = arith.constant 0 : index
    %c0_3 = arith.constant 0 : index
    %1 = vector.load %arg2[%c0_1, %c0_2, %c0_3] : memref<2x16x16xf32, #tpu.memory_space<vmem>>, vector<1x16x16xf32>
    %2 = vector.shape_cast %1 : vector<1x16x16xf32> to vector<16x16xf32>
    %c1 = arith.constant 1 : index
    %c0_4 = arith.constant 0 : index
    %c0_5 = arith.constant 0 : index
    %3 = vector.load %arg2[%c1, %c0_4, %c0_5] : memref<2x16x16xf32, #tpu.memory_space<vmem>>, vector<1x16x16xf32>
    %4 = vector.shape_cast %3 : vector<1x16x16xf32> to vector<16x16xf32>
    %c0_6 = arith.constant 0 : index
    %c0_7 = arith.constant 0 : index
    %5 = vector.load %arg6[%c0_6, %c0_7] : memref<8x128xf32, #tpu.memory_space<vmem>>, vector<8x128xf32>
    %6 = vector.extract_strided_slice %5 {offsets = [0, 0], sizes = [1, 128], strides = [1, 1]} : vector<8x128xf32> to vector<1x128xf32>
    %7 = vector.extract_strided_slice %5 {offsets = [1, 0], sizes = [1, 32], strides = [1, 1]} : vector<8x128xf32> to vector<1x32xf32>
    %8 = vector.extract_strided_slice %5 {offsets = [2, 0], sizes = [1, 32], strides = [1, 1]} : vector<8x128xf32> to vector<1x32xf32>
    %9 = vector.extract_strided_slice %5 {offsets = [3, 0], sizes = [1, 32], strides = [1, 1]} : vector<8x128xf32> to vector<1x32xf32>
    %10 = vector.extract_strided_slice %5 {offsets = [4, 0], sizes = [1, 32], strides = [1, 1]} : vector<8x128xf32> to vector<1x32xf32>
    %11 = vector.extract_strided_slice %5 {offsets = [5, 0], sizes = [1, 32], strides = [1, 1]} : vector<8x128xf32> to vector<1x32xf32>
    %c0_8 = arith.constant 0 : index
    %c0_9 = arith.constant 0 : index
    %12 = vector.load %arg3[%c0_8, %c0_9] : memref<32x128xf32, #tpu.memory_space<vmem>>, vector<32x128xf32>
    %cst = arith.constant dense<0.000000e+00> : vector<16x128xf32>
    %13 = tpu.matmul %0, %12, %cst {dimension_numbers = #tpu.dot_dimension_numbers<[1], [0], [0], [1], [0, 0, 1, 1], [], []>} : vector<16x32xf32>, vector<32x128xf32>, vector<16x128xf32> -> vector<16x128xf32>
    %14 = tpu.iota {dimensions = array<i32: 1>} : vector<1x128xi32>
    %c64_i32 = arith.constant 64 : i32
    %15 = vector.broadcast %c64_i32 : i32 to vector<1x128xi32>
    %16 = arith.cmpi slt, %14, %15 : vector<1x128xi32>
    %cst_10 = arith.constant dense<0.000000e+00> : vector<16x128xf32>
    %17 = tpu.matmul %2, %13, %cst_10 {dimension_numbers = #tpu.dot_dimension_numbers<[1], [0], [0], [1], [0, 0, 1, 1], [], []>} : vector<16x16xf32>, vector<16x128xf32>, vector<16x128xf32> -> vector<16x128xf32>
    %cst_11 = arith.constant dense<0.000000e+00> : vector<16x128xf32>
    %18 = tpu.matmul %4, %13, %cst_11 {dimension_numbers = #tpu.dot_dimension_numbers<[1], [0], [0], [1], [0, 0, 1, 1], [], []>} : vector<16x16xf32>, vector<16x128xf32>, vector<16x128xf32> -> vector<16x128xf32>
    %19 = vector.shape_cast %16 : vector<1x128xi1> to vector<1x128xi1>
    %20 = vector.broadcast %19 : vector<1x128xi1> to vector<16x128xi1>
    %21 = arith.select %20, %17, %18 : vector<16x128xi1>, vector<16x128xf32>
    %22 = vector.broadcast %6 : vector<1x128xf32> to vector<16x128xf32>
    %23 = arith.addf %21, %22 : vector<16x128xf32>
    %cst_12 = arith.constant 0.000000e+00 : f32
    %24 = vector.broadcast %cst_12 : f32 to vector<16x128xf32>
    %25 = arith.maximumf %23, %24 : vector<16x128xf32>
    %c0_13 = arith.constant 0 : index
    %c0_14 = arith.constant 0 : index
    %26 = vector.load %arg4[%c0_13, %c0_14] : memref<128x32xf32, #tpu.memory_space<vmem>>, vector<128x32xf32>
    %cst_15 = arith.constant dense<0.000000e+00> : vector<16x32xf32>
    %27 = tpu.matmul %25, %26, %cst_15 {dimension_numbers = #tpu.dot_dimension_numbers<[1], [0], [0], [1], [0, 0, 1, 1], [], []>} : vector<16x128xf32>, vector<128x32xf32>, vector<16x32xf32> -> vector<16x32xf32>
    %28 = tpu.iota {dimensions = array<i32: 1>} : vector<1x32xi32>
    %c16_i32 = arith.constant 16 : i32
    %29 = vector.broadcast %c16_i32 : i32 to vector<1x32xi32>
    %30 = arith.cmpi slt, %28, %29 : vector<1x32xi32>
    %cst_16 = arith.constant dense<0.000000e+00> : vector<16x32xf32>
    %31 = tpu.matmul %2, %27, %cst_16 {dimension_numbers = #tpu.dot_dimension_numbers<[1], [0], [0], [1], [0, 0, 1, 1], [], []>} : vector<16x16xf32>, vector<16x32xf32>, vector<16x32xf32> -> vector<16x32xf32>
    %cst_17 = arith.constant dense<0.000000e+00> : vector<16x32xf32>
    %32 = tpu.matmul %4, %27, %cst_17 {dimension_numbers = #tpu.dot_dimension_numbers<[1], [0], [0], [1], [0, 0, 1, 1], [], []>} : vector<16x16xf32>, vector<16x32xf32>, vector<16x32xf32> -> vector<16x32xf32>
    %33 = vector.shape_cast %30 : vector<1x32xi1> to vector<1x32xi1>
    %34 = vector.broadcast %33 : vector<1x32xi1> to vector<16x32xi1>
    %35 = arith.select %34, %31, %32 : vector<16x32xi1>, vector<16x32xf32>
    %36 = vector.broadcast %7 : vector<1x32xf32> to vector<16x32xf32>
    %37 = arith.addf %35, %36 : vector<16x32xf32>
    %cst_18 = arith.constant dense<0.000000e+00> : vector<16xf32>
    %38 = vector.multi_reduction <add>, %37, %cst_18 [1] : vector<16x32xf32> to vector<16xf32>
    %39 = vector.shape_cast %38 : vector<16xf32> to vector<16x1xf32>
    %cst_19 = arith.constant 3.200000e+01 : f32
    %40 = vector.broadcast %cst_19 : f32 to vector<16x1xf32>
    %41 = arith.divf %39, %40 : vector<16x1xf32>
    %42 = vector.broadcast %41 : vector<16x1xf32> to vector<16x32xf32>
    %43 = arith.subf %37, %42 : vector<16x32xf32>
    %44 = arith.mulf %43, %43 : vector<16x32xf32>
    %cst_20 = arith.constant dense<0.000000e+00> : vector<16xf32>
    %45 = vector.multi_reduction <add>, %44, %cst_20 [1] : vector<16x32xf32> to vector<16xf32>
    %46 = vector.shape_cast %45 : vector<16xf32> to vector<16x1xf32>
    %cst_21 = arith.constant 3.100000e+01 : f32
    %47 = vector.broadcast %cst_21 : f32 to vector<16x1xf32>
    %48 = arith.divf %46, %47 : vector<16x1xf32>
    %49 = math.sqrt %48 : vector<16x1xf32>
    %50 = vector.broadcast %8 : vector<1x32xf32> to vector<16x32xf32>
    %51 = arith.mulf %50, %43 : vector<16x32xf32>
    %cst_22 = arith.constant 9.99999997E-7 : f32
    %52 = vector.broadcast %cst_22 : f32 to vector<16x1xf32>
    %53 = arith.addf %49, %52 : vector<16x1xf32>
    %54 = vector.broadcast %53 : vector<16x1xf32> to vector<16x32xf32>
    %55 = arith.divf %51, %54 : vector<16x32xf32>
    %56 = vector.broadcast %9 : vector<1x32xf32> to vector<16x32xf32>
    %57 = arith.addf %55, %56 : vector<16x32xf32>
    %58 = arith.addf %57, %0 : vector<16x32xf32>
    %c0_23 = arith.constant 0 : index
    %c0_24 = arith.constant 0 : index
    %c0_25 = arith.constant 0 : index
    %59 = vector.load %arg5[%c0_23, %c0_24, %c0_25] : memref<2x32x32xf32, #tpu.memory_space<vmem>>, vector<1x32x32xf32>
    %60 = vector.shape_cast %59 : vector<1x32x32xf32> to vector<32x32xf32>
    %cst_26 = arith.constant dense<0.000000e+00> : vector<16x32xf32>
    %61 = tpu.matmul %58, %60, %cst_26 {dimension_numbers = #tpu.dot_dimension_numbers<[1], [0], [0], [1], [0, 0, 1, 1], [], []>} : vector<16x32xf32>, vector<32x32xf32>, vector<16x32xf32> -> vector<16x32xf32>
    %62 = vector.broadcast %10 : vector<1x32xf32> to vector<16x32xf32>
    %63 = arith.addf %61, %62 : vector<16x32xf32>
    %cst_27 = arith.constant 0.000000e+00 : f32
    %64 = vector.broadcast %cst_27 : f32 to vector<16x32xf32>
    %65 = arith.maximumf %63, %64 : vector<16x32xf32>
    %c1_28 = arith.constant 1 : index
    %c0_29 = arith.constant 0 : index
    %c0_30 = arith.constant 0 : index
    %66 = vector.load %arg5[%c1_28, %c0_29, %c0_30] : memref<2x32x32xf32, #tpu.memory_space<vmem>>, vector<1x32x32xf32>
    %67 = vector.shape_cast %66 : vector<1x32x32xf32> to vector<32x32xf32>
    %cst_31 = arith.constant dense<0.000000e+00> : vector<16x32xf32>
    %68 = tpu.matmul %65, %67, %cst_31 {dimension_numbers = #tpu.dot_dimension_numbers<[1], [0], [0], [1], [0, 0, 1, 1], [], []>} : vector<16x32xf32>, vector<32x32xf32>, vector<16x32xf32> -> vector<16x32xf32>
    %69 = vector.broadcast %11 : vector<1x32xf32> to vector<16x32xf32>
    %70 = arith.addf %68, %69 : vector<16x32xf32>
    %71 = arith.addf %70, %58 : vector<16x32xf32>
    %c0_32 = arith.constant 0 : index
    %c0_33 = arith.constant 0 : index
    %72 = vector.load %arg7[%c0_32, %c0_33] : memref<16x32xf32, #tpu.memory_space<vmem>>, vector<16x32xf32>
    tpu.vector_store %arg7[%c0_32, %c0_33], %71 {strides = array<i32>} : memref<16x32xf32, #tpu.memory_space<vmem>>, vector<16x32xf32>,
    return
  }
  func.func @transform_0(%arg0: i32) -> (i32, i32) {
    %c0_i32 = arith.constant 0 : i32
    %c0_i32_0 = arith.constant 0 : i32
    %c0_i32_1 = arith.constant 0 : i32
    return %c0_i32, %c0_i32_0 : i32, i32
  }
  func.func @transform_1(%arg0: i32) -> (i32, i32, i32) {
    %c0_i32 = arith.constant 0 : i32
    %c0_i32_0 = arith.constant 0 : i32
    %c0_i32_1 = arith.constant 0 : i32
    %c0_i32_2 = arith.constant 0 : i32
    return %c0_i32, %c0_i32_0, %c0_i32_1 : i32, i32, i32
  }
  func.func @transform_2(%arg0: i32) -> (i32, i32) {
    %c0_i32 = arith.constant 0 : i32
    %c0_i32_0 = arith.constant 0 : i32
    %c0_i32_1 = arith.constant 0 : i32
    return %c0_i32, %c0_i32_0 : i32, i32
  }
  func.func @transform_3(%arg0: i32) -> (i32, i32) {
    %c0_i32 = arith.constant 0 : i32
    %c0_i32_0 = arith.constant 0 : i32
    %c0_i32_1 = arith.constant 0 : i32
    return %c0_i32, %c0_i32_0 : i32, i32
  }
  func.func @transform_4(%arg0: i32) -> (i32, i32, i32) {
    %c0_i32 = arith.constant 0 : i32
    %c0_i32_0 = arith.constant 0 : i32
    %c0_i32_1 = arith.constant 0 : i32
    %c0_i32_2 = arith.constant 0 : i32
    return %c0_i32, %c0_i32_0, %c0_i32_1 : i32, i32, i32
  }
  func.func @transform_5(%arg0: i32) -> (i32, i32) {
    %c0_i32 = arith.constant 0 : i32
    %c0_i32_0 = arith.constant 0 : i32
    %c0_i32_1 = arith.constant 0 : i32
    return %c0_i32, %c0_i32_0 : i32, i32
  }
  func.func @transform_6(%arg0: i32) -> (i32, i32) {
    %c0_i32 = arith.constant 0 : i32
    %c0_i32_0 = arith.constant 0 : i32
    %c0_i32_1 = arith.constant 0 : i32
    return %c0_i32, %c0_i32_0 : i32, i32
  }
}

</mosaic_0001>

<bundles_post_ra>
// kernel: tpu_custom_call.1
= control target key start
LH: loop header
LB: loop body
LE: loop exit
PB: predicated region body
PF: predicated region fallthrough
CT: control target
= control target key end

     0   :  { %vm36_vm0 = vcmask 261120   ;;  %s1196_s0 = inlined_call_operand.vmem [shape: f32[16,32], index: 0, kind: input, shape index: {}]   ;;  %s1197_s1 = inlined_call_operand.vmem [shape: f32[2,16,16], index: 1, kind: input, shape index: {}]   ;;  %s1198_s2 = inlined_call_operand.vmem [shape: f32[32,128], index: 2, kind: input, shape index: {}]   ;;  %s1199_s3 = inlined_call_operand.vmem [shape: f32[128,32], index: 3, kind: input, shape index: {}]   ;;  %s1200_s4 = inlined_call_operand.vmem [shape: f32[2,32,32], index: 4, kind: input, shape index: {}]   ;;  %s1201_s5 = inlined_call_operand.vmem [shape: f32[8,128], index: 5, kind: input, shape index: {}]   ;;  %s1202_s6 = inlined_call_operand.hbm [shape: f32[16,32], index: 6, kind: output, shape index: {}]  }
   0x1   :  { %v35_v0 = vld [vmem:[%s1198_s2 + $0x18] sm:$0xff]  ;;  %v34_v1 = vld [vmem:[%s1198_s2 + $0x10] sm:$0xff]  ;;  %v1053_v2 = vld [vmem:[%s1196_s0] sm:$0xff] }
   0x2   :  { %877 = vmatprep.subr.mxu0 %v35_v0  ;;  %v33_v3 = vld [vmem:[%s1198_s2 + $0x8] sm:$0xff]  ;;  %885 = vmatprep.mubr.msk.f32.mxu0 %vm36_vm0, %v1053_v2 }
   0x3   :  { %878 = vmatpush3.msra.mxu0 %v35_v0 }
   0x4   :  { %11 = vsyncpa [#allocation3], 0  ;;  %879 = vmatprep.subr.mxu0 %v34_v1  ;;  %v32_v4 = vld [vmem:[%s1198_s2] sm:$0xff]  ;;  %v1066_v5 = vld [vmem:[%s1196_s0 + $0x8] sm:$0xff]  ;;  %vm121_vm1 = vcmask 130048   ;;  %v118_v28 = vlaneseq }
   0x5   :  { %880 = vmatpush3.msra.mxu0 %v34_v1  ;;  %v26_v6 = vld [vmem:[%s1197_s1] sm:$0xff]  ;;  %v311_v7 = vld [vmem:[%s1199_s3 + $0x78] sm:$0xff]  ;;  %v310_v8 = vld [vmem:[%s1199_s3 + $0x70] sm:$0xff] }
   0x6   :  { %881 = vmatprep.subr.mxu0 %v33_v3  ;;  %892 = vmatprep.mubr.msk.f32.mxu1 %vm121_vm1, %v26_v6  ;;  %v309_v9 = vld [vmem:[%s1199_s3 + $0x68] sm:$0xff]  ;;  %v308_v10 = vld [vmem:[%s1199_s3 + $0x60] sm:$0xff]  ;;  %v307_v11 = vld [vmem:[%s1199_s3 + $0x58] sm:$0xff]  ;;  %v1135_v29 = vshrl.u32 %v118_v28, 7  ;;  %v119_v30 = vand.u32 127, %v118_v28 }
   0x7   :  { %882 = vmatpush3.msra.mxu0 %v33_v3  ;;  %v306_v12 = vld [vmem:[%s1199_s3 + $0x50] sm:$0xff]  ;;  %v305_v13 = vld [vmem:[%s1199_s3 + $0x48] sm:$0xff]  ;;  %v304_v14 = vld [vmem:[%s1199_s3 + $0x40] sm:$0xff] }
   0x8   :  { %883 = vmatprep.subr.mxu0 %v32_v4  ;;  %v303_v15 = vld [vmem:[%s1199_s3 + $0x38] sm:$0xff]  ;;  %v302_v16 = vld [vmem:[%s1199_s3 + $0x30] sm:$0xff]  ;;  %v27_v19 = vld [vmem:[%s1197_s1 + $0x8] sm:$0xff]  ;;  %v290_v31 = vsub.s32 0, %v1135_v29  ;;  %vm120_vm2 = vcmp.lt.s32.totalorder %v119_v30, 64  ;;  %v544_v48 = vsub.s32 1, %v1135_v29 }
   0x9   :  { %884 = vmatpush3.msra.mxu0 %v32_v4  ;;  %v805_v20 = vld [vmem:[%s1197_s1 + $0x10] sm:$0xff]  ;;  %v806_v21 = vld [vmem:[%s1197_s1 + $0x18] sm:$0xff]  ;;  %v301_v22 = vld [vmem:[%s1199_s3 + $0x28] sm:$0xff]  ;;  %vm387_vm3 = vcmp.lt.s32.totalorder %v119_v30, 16  ;;  %v598_v28 = vsub.s32 3, %v1135_v29 }
   0xa   :  { %886 = vmatmul.mubr.msk.f32.vlgmr.msra.gmra.mxu0 %vm36_vm0, %v1066_v5  ;;  %902 = vmatprep.subr.mxu0 %v311_v7  ;;  %v300_v23 = vld [vmem:[%s1199_s3 + $0x20] sm:$0xff]  ;;  %v299_v24 = vld [vmem:[%s1199_s3 + $0x18] sm:$0xff]  ;;  %v298_v25 = vld [vmem:[%s1199_s3 + $0x10] sm:$0xff] }
   0xb   :  { %903 = vmatpush3.msra.mxu0 %v311_v7  ;;  %v297_v26 = vld [vmem:[%s1199_s3 + $0x8] sm:$0xff]  ;;  %v296_v27 = vld [vmem:[%s1199_s3] sm:$0xff]  ;;  %v606_v7 = vld [vmem:[%s1200_s4 + $0x10] sm:$0xff] }
   0xc   :  { %904 = vmatprep.subr.mxu0 %v310_v8  ;;  %v1141_v33 = vld [vmem:[%s1201_s5] sm:$0xff] }
   0xd   :  { %905 = vmatpush3.msra.mxu0 %v310_v8  ;;  %v291_v35 = vrot.slane %v1141_v33, %v290_v31  ;;  %v545_v51 = vrot.slane %v1141_v33, %v544_v48  ;;  %v605_v8 = vld [vmem:[%s1200_s4 + $0x8] sm:$0xff]  ;;  %v599_v31 = vrot.slane %v1141_v33, %v598_v28 }
   0xe   :  { %906 = vmatprep.subr.mxu0 %v309_v9 }
   0xf   :  { %907 = vmatpush3.msra.mxu0 %v309_v9  ;;  %v604_v9 = vld [vmem:[%s1200_s4] sm:$0xff] }
  0x10   :  { %908 = vmatprep.subr.mxu0 %v308_v10 }
  0x11   :  { %909 = vmatpush3.msra.mxu0 %v308_v10 }
  0x12   :  { %910 = vmatprep.subr.mxu0 %v307_v11 }
  0x13   :  { %911 = vmatpush3.msra.mxu0 %v307_v11 }
  0x14   :  { %912 = vmatprep.subr.mxu0 %v306_v12 }
  0x15   :  { %913 = vmatpush3.msra.mxu0 %v306_v12 }
  0x16   :  { %914 = vmatprep.subr.mxu0 %v305_v13 }
  0x17   :  { %915 = vmatpush3.msra.mxu0 %v305_v13 }
  0x18   :  { %916 = vmatprep.subr.mxu0 %v304_v14 }
  0x19   :  { %917 = vmatpush3.msra.mxu0 %v304_v14 }
  0x1a   :  { %918 = vmatprep.subr.mxu0 %v303_v15 }
  0x1b   :  { %919 = vmatpush3.msra.mxu0 %v303_v15 }
  0x1c   :  { %920 = vmatprep.subr.mxu0 %v302_v16 }
  0x1d   :  { %921 = vmatpush3.msra.mxu0 %v302_v16 }
  0x1e   :  { %922 = vmatprep.subr.mxu0 %v301_v22 }
  0x1f   :  { %923 = vmatpush3.msra.mxu0 %v301_v22 }
  0x20   :  { %924 = vmatprep.subr.mxu0 %v300_v23 }
  0x21   :  { %925 = vmatpush3.msra.mxu0 %v300_v23 }
  0x22   :  { %926 = vmatprep.subr.mxu0 %v299_v24 }
  0x23   :  { %927 = vmatpush3.msra.mxu0 %v299_v24 }
  0x24   :  { %928 = vmatprep.subr.mxu0 %v298_v25 }
  0x25   :  { %929 = vmatpush3.msra.mxu0 %v298_v25 }
  0x26   :  { %930 = vmatprep.subr.mxu0 %v297_v26 }
  0x27   :  { %931 = vmatpush3.msra.mxu0 %v297_v26  ;;  %v586_v26 = vsub.s32 2, %v1135_v29 }
  0x28   :  { %932 = vmatprep.subr.mxu0 %v296_v27 }
  0x29   :  { %933 = vmatpush3.msra.mxu0 %v296_v27  ;;  %v587_v27 = vrot.slane %v1141_v33, %v586_v26 }
  0xca   :  { %v887_v17 = vpop.f32.mrf.mxu0 }
  0xcb   :  { %888 = vmatprep.subr.mxu1 %v887_v17 }
  0xcc   :  { %v109_v18 = vpop.f32.mrf.mxu0  ;;  %889 = vmatpush3.msra.mxu1 %v887_v17 }
  0xcd   :  { %890 = vmatprep.subr.mxu1 %v109_v18 }
  0xce   :  { %891 = vmatpush3.msra.mxu1 %v109_v18 }
  0xcf   :  { %893 = vmatmul.mubr.msk.f32.vlgmr.msra.gmra.mxu1 %vm121_vm1, %v27_v19  ;;  %895 = vmatprep.subr.mxu1 %v887_v17 }
  0xd0   :  { %896 = vmatpush3.msra.mxu1 %v887_v17  ;;  %899 = vmatprep.mubr.msk.f32.mxu1 %vm121_vm1, %v805_v20 }
  0xd1   :  { %897 = vmatprep.subr.mxu1 %v109_v18 }
  0xd2   :  { %898 = vmatpush3.msra.mxu1 %v109_v18 }
  0xd3   :  { %900 = vmatmul.mubr.msk.f32.vlgmr.msra.gmra.mxu1 %vm121_vm1, %v806_v21 }
  0xd4   :  { %941 = vmatprep.mubr.msk.f32.mxu1 %vm121_vm1, %v26_v6  ;;  %v607_v6 = vld [vmem:[%s1200_s4 + $0x18] sm:$0xff] }
 0x18f   :  { %v894_v32 = vpop.f32.mrf.mxu1 }
 0x191   :  { %v194_v34 = vpop.f32.mrf.mxu1 }
 0x193   :  { %v901_v36 = vpop.f32.mrf.mxu1 }
 0x194   :  { %v287_v37 = vsel %vm120_vm2, %v894_v32, %v901_v36 }
 0x195   :  { %v275_v38 = vpop.f32.mrf.mxu1  ;;  %v293_v39 = vadd.f32 %v291_v35, %v287_v37 }
 0x196   :  { %v286_v40 = vsel %vm120_vm2, %v194_v34, %v275_v38 }
 0x197   :  { %v292_v41 = vadd.f32 %v291_v35, %v286_v40  ;;  %v295_v43 = vmax.f32 %v293_v39, 0.0 }
 0x199   :  { %v294_v42 = vmax.f32 %v292_v41, 0.0 }
 0x19b   :  { %934 = vmatprep.mubr.f32.mxu0 %v294_v42  ;;  %v822_v42 = vld [vmem:[%s1200_s4 + $0x38] sm:$0xff] }
 0x19c   :  { %935 = vmatmul.mubr.f32.vlgmr.msra.gmra.mxu0 %v295_v43  ;;  %v821_v43 = vld [vmem:[%s1200_s4 + $0x30] sm:$0xff] }
 0x25c   :  { %v936_v44 = vpop.f32.mrf.mxu0 }
 0x25d   :  { %937 = vmatprep.subr.mxu1 %v936_v44 }
 0x25e   :  { %v378_v45 = vpop.f32.mrf.mxu0  ;;  %938 = vmatpush3.msra.mxu1 %v936_v44 }
 0x25f   :  { %939 = vmatprep.subr.mxu1 %v378_v45 }
 0x260   :  { %940 = vmatpush3.msra.mxu1 %v378_v45 }
 0x261   :  { %942 = vmatmul.mubr.msk.f32.vlgmr.msra.gmra.mxu1 %vm121_vm1, %v27_v19  ;;  %944 = vmatprep.subr.mxu1 %v936_v44 }
 0x262   :  { %945 = vmatpush3.msra.mxu1 %v936_v44  ;;  %948 = vmatprep.mubr.msk.f32.mxu1 %vm121_vm1, %v805_v20  ;;  %v610_v44 = vsub.s32 4, %v1135_v29 }
 0x263   :  { %946 = vmatprep.subr.mxu1 %v378_v45 }
 0x264   :  { %947 = vmatpush3.msra.mxu1 %v378_v45  ;;  %v611_v45 = vrot.slane %v1141_v33, %v610_v44 }
 0x265   :  { %949 = vmatmul.mubr.msk.f32.vlgmr.msra.gmra.mxu1 %vm121_vm1, %v806_v21  ;;  %951 = vmatprep.subr.mxu1 %v607_v6 }
 0x266   :  { %952 = vmatpush3.msra.mxu1 %v607_v6 }
 0x267   :  { %953 = vmatprep.subr.mxu1 %v606_v7 }
 0x268   :  { %954 = vmatpush3.msra.mxu1 %v606_v7 }
 0x269   :  { %955 = vmatprep.subr.mxu1 %v605_v8 }
 0x26a   :  { %956 = vmatpush3.msra.mxu1 %v605_v8 }
 0x26b   :  { %957 = vmatprep.subr.mxu1 %v604_v9 }
 0x26c   :  { %958 = vmatpush3.msra.mxu1 %v604_v9 }
 0x26d   :  { %962 = vmatprep.subr.mxu1 %v822_v42 }
 0x321   :  { %v943_v46 = vpop.f32.mrf.mxu1 }
 0x323   :  { %v454_v47 = vpop.f32.mrf.mxu1 }
 0x325   :  { %v950_v49 = vpop.f32.mrf.mxu1 }
 0x326   :  { %v541_v52 = vsel %vm387_vm3, %v943_v46, %v950_v49 }
 0x327   :  { %v529_v50 = vpop.f32.mrf.mxu1  ;;  %v547_v56 = vadd.f32 %v545_v51, %v541_v52  ;;  %v702_v52 = vsub.s32 5, %v1135_v29 }
 0x328   :  { %v540_v53 = vsel %vm387_vm3, %v454_v47, %v529_v50 }
 0x329   :  { %v546_v54 = vadd.f32 %v545_v51, %v540_v53  ;;  %v551_v57 = vsel %vm36_vm0, %v547_v56, 0.0  ;;  %v703_v53 = vrot.slane %v1141_v33, %v702_v52 }
 0x32b   :  { %v548_v55 = vsel %vm36_vm0, %v546_v54, 0.0 }
 0x32c   :  { %549 = vadd.xlane.f32.xlu0 %v548_v55 }
 0x330   :  { %552 = vadd.xlane.f32.xlu0 %v551_v57 }
 0x3b5   :  { %v550_v58 = vpop.xlane.xlu0 %549 }
 0x3b6   :  { %v555_v59 = vmul.f32 0.03125, %v550_v58 }
 0x3b8   :  { %v557_v60 = vsub.f32 %v546_v54, %v555_v59 }
 0x3b9   :  { %v553_v61 = vpop.xlane.xlu0 %552 }
 0x3ba   :  { %v556_v62 = vmul.f32 0.03125, %v553_v61  ;;  %v559_v63 = vmul.f32 %v557_v60, %v557_v60  ;;  %v588_v30 = vmul.f32 %v587_v27, %v557_v60 }
 0x3bc   :  { %v558_v0 = vsub.f32 %v547_v56, %v556_v62  ;;  %v561_v1 = vsel %vm36_vm0, %v559_v63, 0.0 }
 0x3bd   :  { %562 = vadd.xlane.f32.xlu1 %v561_v1 }
 0x3be   :  { %v560_v3 = vmul.f32 %v558_v0, %v558_v0  ;;  %v589_v35 = vmul.f32 %v587_v27, %v558_v0 }
 0x3c0   :  { %v564_v4 = vsel %vm36_vm0, %v560_v3, 0.0 }
 0x3c1   :  { %565 = vadd.xlane.f32.xlu1 %v564_v4 }
 0x446   :  { %v563_v10 = vpop.xlane.xlu1 %562 }
 0x447   :  { %v568_v11 = vmul.f32 0.032258064, %v563_v10 }
 0x449   :  { %976 = vrsqrt.f32 %v568_v11  ;;  %vm572_vm4 = vcmp.eq.f32.partialorder %v568_v11, inf  ;;  %v575_v16 = vand.u32 2147483648, %v568_v11  ;;  %vm574_vm5 = vcmp.eq.f32.partialorder %v568_v11, 0.0 }
 0x44a   :  { %v566_v12 = vpop.xlane.xlu1 %565 }
 0x44b   :  { %v569_v13 = vmul.f32 0.032258064, %v566_v12 }
 0x44d   :  { %978 = vrsqrt.f32 %v569_v13  ;;  %vm579_vm6 = vcmp.eq.f32.partialorder %v569_v13, inf  ;;  %v582_v22 = vand.u32 2147483648, %v569_v13  ;;  %vm581_vm7 = vcmp.eq.f32.partialorder %v569_v13, 0.0 }
 0x456   :  { %v977_v14 = vpop.eup %976 }
 0x457   :  { %v571_v15 = vmul.f32 %v977_v14, %v568_v11 }
 0x459   :  { %v573_v17 = vsel %vm572_vm4, %v568_v11, %v571_v15 }
 0x45a   :  { %v979_v18 = vpop.eup %978  ;;  %v576_v19 = vsel %vm574_vm5, %v575_v16, %v573_v17 }
 0x45b   :  { %v590_v20 = vadd.f32 1e-06, %v576_v19  ;;  %v578_v21 = vmul.f32 %v979_v18, %v569_v13 }
 0x45d   :  { %980 = vrcp.f32 %v590_v20  ;;  %v580_v23 = vsel %vm579_vm6, %v569_v13, %v578_v21 }
 0x45e   :  { %v583_v24 = vsel %vm581_vm7, %v582_v22, %v580_v23 }
 0x45f   :  { %v591_v25 = vadd.f32 1e-06, %v583_v24 }
 0x461   :  { %982 = vrcp.f32 %v591_v25 }
 0x46a   :  { %v981_v32 = vpop.eup %980 }
 0x46b   :  { %v593_v34 = vmul.f32 %v981_v32, %v588_v30 }
 0x46d   :  { %v600_v36 = vadd.f32 %v599_v31, %v593_v34 }
 0x46e   :  { %v983_v37 = vpop.eup %982 }
 0x46f   :  { %v595_v38 = vmul.f32 %v983_v37, %v589_v35  ;;  %v602_v39 = vadd.f32 %v600_v36, %v1053_v2  ;;  %v820_v2 = vld [vmem:[%s1200_s4 + $0x28] sm:$0xff] }
 0x471   :  { %v601_v40 = vadd.f32 %v599_v31, %v595_v38  ;;  %959 = vmatprep.mubr.msk.f32.mxu1 %vm36_vm0, %v602_v39 }
 0x473   :  { %v603_v41 = vadd.f32 %v601_v40, %v1066_v5  ;;  %v819_v5 = vld [vmem:[%s1200_s4 + $0x20] sm:$0xff]  ;;  %s1006_s4 = smov [#allocation2]  }
 0x474   :  { %s794_s11 = sshll.u32 %s1006_s4, 4  ;;  %s795_s11 = int_to_ptr.vmem [resolvable:$true] %s794_s11 }
 0x475   :  { %960 = vmatmul.mubr.msk.f32.vlgmr.msra.gmra.mxu1 %vm36_vm0, %v603_v41  ;;  %s984_s12 = scalar_lea.vmem %s795_s11, 256  ;;  %p989_p1 = scmp.lt.s32.totalorder %s795_s11, %s795_s11 }
 0x476   :  { %963 = vmatpush3.msra.mxu1 %v822_v42  ;;  %p985_p0 = scmp.ne.s32.totalorder %s795_s11, %s984_s12  ;;  %p990_p2 = scmp.lt.s32.totalorder %s984_s12, %s984_s12 }
 0x477   :  { %964 = vmatprep.subr.mxu1 %v821_v43 }
 0x478   :  { %965 = vmatpush3.msra.mxu1 %v821_v43  ;;  %p991_p3 = por %p990_p2, %p989_p1 }
 0x479   :  { %966 = vmatprep.subr.mxu1 %v820_v2 }
 0x47a   :  { %967 = vmatpush3.msra.mxu1 %v820_v2  ;;  %p992_p4 = pnand %p991_p3, %p985_p0 }
 0x47b   :  { %968 = vmatprep.subr.mxu1 %v819_v5 }
 0x47c   :  { %969 = vmatpush3.msra.mxu1 %v819_v5 }
 0x535   :  { %v961_v46 = vpop.f32.mrf.mxu1 }
 0x536   :  { %v690_v47 = vadd.f32 %v961_v46, %v611_v45 }
 0x537   :  { %v684_v48 = vpop.f32.mrf.mxu1 }
 0x538   :  { %v685_v49 = vadd.f32 %v684_v48, %v611_v45  ;;  %v694_v51 = vmax.f32 %v690_v47, 0.0 }
 0x53a   :  { %v693_v50 = vmax.f32 %v685_v49, 0.0 }
 0x53c   :  { %970 = vmatprep.mubr.msk.f32.mxu1 %vm36_vm0, %v693_v50 }
 0x53d   :  { %971 = vmatmul.mubr.msk.f32.vlgmr.msra.gmra.mxu1 %vm36_vm0, %v694_v51 }
 0x5fd   :  { %v972_v54 = vpop.f32.mrf.mxu1 }
 0x5fe   :  { %v782_v55 = vadd.f32 %v972_v54, %v703_v53 }
 0x5ff   :  { %v776_v56 = vpop.f32.mrf.mxu1 }
 0x600   :  { %v786_v57 = vadd.f32 %v782_v55, %v603_v41  ;;  %v777_v58 = vadd.f32 %v776_v56, %v703_v53 }
 0x602   :  { %788 = vst.msk [vmem:[#allocation2 + $0x8] sm:$0xff] %vm36_vm0, %v786_v57  ;;  %v785_v59 = vadd.f32 %v777_v58, %v602_v39 }
 0x604   :  { %787 = vst.msk [vmem:[#allocation2] sm:$0xff] %vm36_vm0, %v785_v59 }
 0x605   :  { %995 = shalt.err (!%p992_p4)
}
 0x606   :  { %s1007_s13 = smov 128   ;;  %s1008_s0 = smov 8  }
 0x607   :  { %800 = dma.vmem_to_hbm [thread:$0]  %s795_s11, 256, %s1202_s6, [#allocation3], %s1007_s13, %s1007_s13, %s1008_s0  }
 0x608   :  { %1004 = dma.done.wait [#allocation3], 256  }
 0x609   :  { %1005 = vsyncadd [#allocation3], 4294967040 }
 0x60a   :  { %804 = vsyncpa [#allocation3], 1 }

</bundles_post_ra>
